<compile_context>
chip_gen: v7x
topology: tpu7x:2x2x1
jax: 0.10.0
libtpu: 0.0.40
codegen_flags: <defaults>
</compile_context>

<pallas_src>
import math
from functools import partial

import jax
import jax.numpy as jnp
from jax.experimental import pallas as pl
from jax.experimental.pallas import tpu as pltpu


# ---------------------------------------------------------------------------
# Pallas kernel: one (Bt, C, HWp) block of images per grid step.
# ---------------------------------------------------------------------------
def _eca_kernel(x_ref, w_ref, out_ref, *, C, HW_true, k):
    # x_ref:   (Bt, C, HWp) VMEM, input dtype (f32 or bf16)
    # w_ref:   (k,)         SMEM, f32 conv taps
    # out_ref: (Bt, C, HWp) VMEM, input dtype
    x = x_ref[...]

    # ---- global average pool over the spatial (lane) axis, accumulate in f32 ----
    # Padded lanes (if any) are zeros, so dividing by the true H*W is exact.
    pooled = jnp.sum(x.astype(jnp.float32), axis=-1, keepdims=True) * (1.0 / HW_true)
    # pooled: (Bt, C, 1) f32, channels on sublanes.

    # ---- k-tap 1-D conv over the channel axis, zero padded ----------------------
    # conv[b, c] = sum_t w[t] * pooled[b, c + t - pad]   (pad = (k-1)//2, zeros outside)
    pad = (k - 1) // 2
    if pad > 0:
        zeros = jnp.zeros((pooled.shape[0], pad, 1), jnp.float32)
        padded = jnp.concatenate([zeros, pooled, zeros], axis=1)    # (Bt, C + 2*pad, 1)
    else:
        padded = pooled
    conv = w_ref[0] * padded[:, 0:C, :]
    for t in range(1, k):                                           # k is 1 or 3: unrolled
        conv = conv + w_ref[t] * padded[:, t:t + C, :]

    # ---- sigmoid gate (EUP), broadcast over lanes, multiply ---------------------
    gate = jax.nn.sigmoid(conv)                                     # (Bt, C, 1) f32
    out_ref[...] = (x * gate).astype(out_ref.dtype)


# ---------------------------------------------------------------------------
# Wrapper
# ---------------------------------------------------------------------------
def _pick_batch_block(B, per_image_bytes, target_bytes=1 << 20):
    """Largest divisor of B whose block is ~target_bytes, keeping grid >= 2 when B >= 2."""
    bt = max(1, target_bytes // max(1, per_image_bytes))
    if B >= 2:
        bt = min(bt, B // 2)          # ensure at least 2 grid steps (megacore)
    bt = max(1, min(bt, B))
    while B % bt:
        bt -= 1
    return bt


def eca_forward(x, eca_w):
    """ECA forward. x: (B, C, H, W) NCHW (as in the PyTorch module); eca_w: (k,) conv1d taps."""
    B, C, H, W = x.shape
    HW = H * W
    k = eca_w.shape[0]
    itemsize = jnp.dtype(x.dtype).itemsize

    # Lane-dense layout: present the image as (B, C, H*W); pad H*W to a multiple of 128
    # so loads/stores are full-tile (unmasked) vld/vst.
    HWp = ((HW + 127) // 128) * 128
    x2 = x.reshape(B, C, HW)
    if HWp != HW:
        x2 = jnp.pad(x2, ((0, 0), (0, 0), (0, HWp - HW)))

    # Conv taps live in SMEM (scalar path), not a double-buffered VMEM tile.
    w_smem = eca_w.reshape(k).astype(jnp.float32)

    per_image_bytes = C * HWp * itemsize
    Bt = _pick_batch_block(B, per_image_bytes)
    grid = (B // Bt,)
    block_bytes = Bt * per_image_bytes

    # 2 input + 2 output double buffers per step, plus slack for in-kernel f32 temps.
    vmem_needed = 4 * block_bytes + (2 << 20)
    vmem_limit = int(min(max(vmem_needed, 32 << 20), 64 << 20))

    cost = pl.CostEstimate(
        flops=int(2 * B * C * HWp),            # pool adds + gate multiplies
        transcendentals=int(B * C),            # sigmoid
        bytes_accessed=int(2 * B * C * HWp * itemsize),
    )

    out = pl.pallas_call(
        partial(_eca_kernel, C=C, HW_true=HW, k=k),
        out_shape=jax.ShapeDtypeStruct((B, C, HWp), x.dtype),
        grid_spec=pltpu.PrefetchScalarGridSpec(
            num_scalar_prefetch=0,
            grid=grid,
            in_specs=[
                pl.BlockSpec((Bt, C, HWp), lambda b: (b, 0, 0)),          # images (lane-dense)
                pl.BlockSpec(memory_space=pltpu.MemorySpace.SMEM),        # conv1d taps
            ],
            out_specs=pl.BlockSpec((Bt, C, HWp), lambda b: (b, 0, 0)),
        ),
        compiler_params=pltpu.CompilerParams(
            dimension_semantics=("parallel",),
            vmem_limit_bytes=vmem_limit,
        ),
        cost_estimate=cost,
    )(x2, w_smem)

    if HWp != HW:
        out = out[..., :HW]
    return out.reshape(B, C, H, W)


# ---------------------------------------------------------------------------
# Host-side helpers
# ---------------------------------------------------------------------------
def eca_kernel_size(channels, b=1, gamma=2):
    # Mirrors ECA.kernel_size() in the PyTorch module.
    k = int(abs(math.log2(channels) / gamma + b / gamma))
    return k if k % 2 else k + 1


# ---------------------------------------------------------------------------
# Pure-JAX reference (semantics of the PyTorch module)
# ---------------------------------------------------------------------------
def eca_reference(x, eca_w):
    B, C, H, W = x.shape
    k = eca_w.shape[0]
    pad = (k - 1) // 2
    pooled = x.mean(axis=(2, 3))                              # (B, C)
    padded = jnp.pad(pooled, ((0, 0), (pad, pad)))
    conv = sum(eca_w[t] * padded[:, t:t + C] for t in range(k))
    gate = jax.nn.sigmoid(conv)                               # (B, C)
    return x * gate[:, :, None, None]


# ---------------------------------------------------------------------------
if __name__ == "__main__":
    key = jax.random.PRNGKey(0)
    kx, kw, kx2 = jax.random.split(key, 3)

    # --- Test 1: f32, small batch (Bt = 1, grid = 2) -----------------------------
    B, C, H, W = 2, 32, 16, 16
    x = jax.random.normal(kx, (B, C, H, W), jnp.float32)
    k = eca_kernel_size(C)                                    # C=32 -> k=3
    eca_w = 0.5 * jax.random.normal(kw, (k,), jnp.float32)

    y = jax.block_until_ready(eca_forward(x, eca_w))
    y_ref = eca_reference(x, eca_w)
    assert y.shape == (B, C, H, W)
    err = float(jnp.max(jnp.abs(y - y_ref)))
    assert err < 1e-5, err

    # --- Test 2: bf16 I/O, larger batch so Bt > 1 images per block ----------------
    B2 = 8
    xb = jax.random.normal(kx2, (B2, C, H, W), jnp.float32).astype(jnp.bfloat16)
    yb = jax.block_until_ready(eca_forward(xb, eca_w))
    assert yb.shape == (B2, C, H, W) and yb.dtype == jnp.bfloat16
    yb_ref = eca_reference(xb.astype(jnp.float32), eca_w)
    err_b = float(jnp.max(jnp.abs(yb.astype(jnp.float32) - yb_ref)))
    assert err_b < 5e-2, err_b

    print("KERNEL_OK")
</pallas_src>

<mosaic_0001>
module attributes {stable_mosaic.version = 11 : i64} {
  func.func @_eca_kernel(%arg0: i32, %arg1: memref<1x32x256xf32, #tpu.memory_space<vmem>>, %arg2: memref<3xf32, #tpu.memory_space<smem>>, %arg3: memref<1x32x256xf32, #tpu.memory_space<vmem>>) attributes {dimension_semantics = [#tpu.dimension_semantics<parallel>], iteration_bounds = array<i64: 2>, scalar_prefetch = 0 : i64, scratch_operands = 0 : i64, tpu.core_type = #tpu.core_type<tc>, window_params = [{transform_indices = @transform_0, window_bounds = array<i64: 1, 32, 256>}, {transform_indices = @transform_1, window_bounds = array<i64: 3>}, {transform_indices = @transform_2, window_bounds = array<i64: 1, 32, 256>}]} {
    %c0 = arith.constant 0 : index
    %c0_0 = arith.constant 0 : index
    %c0_1 = arith.constant 0 : index
    %0 = vector.load %arg1[%c0, %c0_0, %c0_1] : memref<1x32x256xf32, #tpu.memory_space<vmem>>, vector<1x32x256xf32>
    %cst = arith.constant dense<0.000000e+00> : vector<1x32xf32>
    %1 = vector.multi_reduction <add>, %0, %cst [2] : vector<1x32x256xf32> to vector<1x32xf32>
    %2 = vector.shape_cast %1 : vector<1x32xf32> to vector<1x32x1xf32>
    %cst_2 = arith.constant 3.906250e-03 : f32
    %3 = vector.broadcast %cst_2 : f32 to vector<1x32x1xf32>
    %4 = arith.mulf %2, %3 : vector<1x32x1xf32>
    %cst_3 = arith.constant 0.000000e+00 : f32
    %5 = vector.broadcast %cst_3 : f32 to vector<1x1x1xf32>
    %6 = tpu.concatenate %5, %4, %5 in 1 : vector<1x1x1xf32>, vector<1x32x1xf32>, vector<1x1x1xf32> -> vector<1x34x1xf32>
    %c0_4 = arith.constant 0 : index
    %7 = memref.load %arg2[%c0_4] : memref<3xf32, #tpu.memory_space<smem>>
    %8 = vector.extract_strided_slice %6 {offsets = [0, 0, 0], sizes = [1, 32, 1], strides = [1, 1, 1]} : vector<1x34x1xf32> to vector<1x32x1xf32>
    %9 = vector.broadcast %7 : f32 to vector<1x32x1xf32>
    %10 = arith.mulf %9, %8 : vector<1x32x1xf32>
    %c1 = arith.constant 1 : index
    %11 = memref.load %arg2[%c1] : memref<3xf32, #tpu.memory_space<smem>>
    %12 = vector.extract_strided_slice %6 {offsets = [0, 1, 0], sizes = [1, 32, 1], strides = [1, 1, 1]} : vector<1x34x1xf32> to vector<1x32x1xf32>
    %13 = vector.broadcast %11 : f32 to vector<1x32x1xf32>
    %14 = arith.mulf %13, %12 : vector<1x32x1xf32>
    %15 = arith.addf %10, %14 : vector<1x32x1xf32>
    %c2 = arith.constant 2 : index
    %16 = memref.load %arg2[%c2] : memref<3xf32, #tpu.memory_space<smem>>
    %17 = vector.extract_strided_slice %6 {offsets = [0, 2, 0], sizes = [1, 32, 1], strides = [1, 1, 1]} : vector<1x34x1xf32> to vector<1x32x1xf32>
    %18 = vector.broadcast %16 : f32 to vector<1x32x1xf32>
    %19 = arith.mulf %18, %17 : vector<1x32x1xf32>
    %20 = arith.addf %15, %19 : vector<1x32x1xf32>
    %21 = arith.negf %20 : vector<1x32x1xf32>
    %22 = math.exp %21 : vector<1x32x1xf32>
    %cst_5 = arith.constant 1.000000e+00 : f32
    %23 = vector.broadcast %cst_5 : f32 to vector<1x32x1xf32>
    %24 = arith.addf %23, %22 : vector<1x32x1xf32>
    %25 = arith.divf %23, %24 : vector<1x32x1xf32>
    %26 = vector.broadcast %25 : vector<1x32x1xf32> to vector<1x32x256xf32>
    %27 = arith.mulf %0, %26 : vector<1x32x256xf32>
    %c0_6 = arith.constant 0 : index
    %c0_7 = arith.constant 0 : index
    %c0_8 = arith.constant 0 : index
    %28 = vector.load %arg3[%c0_6, %c0_7, %c0_8] : memref<1x32x256xf32, #tpu.memory_space<vmem>>, vector<1x32x256xf32>
    tpu.vector_store %arg3[%c0_6, %c0_7, %c0_8], %27 {strides = array<i32>} : memref<1x32x256xf32, #tpu.memory_space<vmem>>, vector<1x32x256xf32>,
    return
  }
  func.func @transform_0(%arg0: i32) -> (i32, i32, i32) {
    %c0_i32 = arith.constant 0 : i32
    %c0_i32_0 = arith.constant 0 : i32
    %c0_i32_1 = arith.constant 0 : i32
    return %arg0, %c0_i32, %c0_i32_0 : i32, i32, i32
  }
  func.func @transform_1(%arg0: i32) -> i32 {
    %c0_i32 = arith.constant 0 : i32
    %c0_i32_0 = arith.constant 0 : i32
    return %c0_i32 : i32
  }
  func.func @transform_2(%arg0: i32) -> (i32, i32, i32) {
    %c0_i32 = arith.constant 0 : i32
    %c0_i32_0 = arith.constant 0 : i32
    %c0_i32_1 = arith.constant 0 : i32
    return %arg0, %c0_i32, %c0_i32_0 : i32, i32, i32
  }
}

</mosaic_0001>

<bundles_post_ra>
// kernel: tpu_custom_call.1
= control target key start
LH: loop header
LB: loop body
LE: loop exit
PB: predicated region body
PF: predicated region fallthrough
CT: control target
= control target key end

     0   :  { %7 = vsyncpa [#allocation3], 0  ;;  %s926_s0 = inlined_call_operand.hbm [shape: f32[2,32,256], index: 0, kind: input, shape index: {}]   ;;  %s927_s1 = inlined_call_operand.vmem [shape: f32[3], index: 1, kind: input, shape index: {}]   ;;  %s928_s2 = inlined_call_operand.hbm [shape: f32[2,32,256], index: 2, kind: output, shape index: {}]  }
   0x1   :  { %9 = vsyncpa [#allocation3 + $0x1], 0 }
   0x2   :  { %10 = vsyncpa [#allocation5], 0 }
   0x3   :  { %11 = vsyncpa [#allocation4], 0 }
   0x4   :  { %13 = vsyncpa [#allocation4 + $0x1], 0  ;;  %s688_s9 = smov 0   ;;  %s690_s10 = smov 0  }
   0x5   :  { %s692_s11 = smov 0   ;;  %s694_s12 = smov 0  }
   0x6 LB: > { %s709_s13 = sadd.s32 4294967295, %s663_s12   ;;  %s444_s14 = sadd.s32 4294967294, %s663_s12   ;;  %s663_s12 = sphi %s694_s12, %s948_s12   ;;  %s659_s11 = sphi %s692_s11, %s947_s11   ;;  %s655_s10 = sphi %s690_s10, %s946_s10   ;;  %s651_s9 = sphi %s688_s9, %s945_s9  }
   0x7   : > { %s713_s15 = sadd.s32 1, %s663_s12   ;;  %s26_s16 = sadd.s32 1, %s659_s11 }
   0x8   : > { %s23_s17 = ssub.s32 %s663_s12, %s713_s15  ;;  %p33_p0 = scmp.ne.s32.totalorder %s659_s11, %s655_s10 }
   0x9   : > { %p24_p1 = scmp.eq.s32.totalorder %s23_s17, 0  ;;  %p34_p2 = scmp.eq.s32.totalorder %s663_s12, 0 }
   0xa   : > { %p39_p3 = scmp.ne.s32.totalorder %s655_s10, %s651_s9  ;;  %p930_p4 = scmp.eq.s32.totalorder %s709_s13, 0 }
   0xb   : > { %s725_s18 = scalar_select %p24_p1, %s659_s11, %s26_s16  }
   0xc   : > { %p727_p5 = por %p34_p2, %p33_p0  ;;  %p733_p6 = por %p930_p4, %p39_p3 }
   0xd   : > { %p84_p7 = scmp.eq.s32.totalorder %s709_s13, 1  ;;  %p90_p8 = scmp.eq.s32.totalorder %s444_s14, 1 }
   0xe   : > { %s933_s20 = scalar_select %p733_p6, 1, 0 }
   0xf   : > { %p445_p9 = scmp.ge.s32.totalorder %s663_s12, 1  ;;  %p97_p10 = scmp.lt.s32.totalorder %s663_s12, 3 }
  0x10   : > { %p740_p11 = por %p84_p7, %p33_p0  ;;  %p744_p12 = por %p90_p8, %p39_p3 }
  0x11   : > { %p748_p13 = pnand %p445_p9, %p97_p10  ;;  %s110_s26 = sshll.u32 %s927_s1, 4  ;;  %s111_s26 = int_to_ptr.vmem [resolvable:$true] %s110_s26 }
  0x12   : > { %s934_s21 = scalar_select %p740_p11, 1, 0 }
  0x13   : > { %s935_s22 = scalar_select %p744_p12, 1, 0 }
  0x14   : > { %p476_p1 = pneg %p748_p13  ;;  %p489_p2 = scmp.lt.s32.totalorder %s663_s12, 2 }
  0x15   : > { %s121_s28 = sand.u32 1, %s659_s11   ;;  %s548_s3 = scalar_lea.vmem %s111_s26, 16 }
  0x16   : > { %p761_p7 = pnand %p476_p1, %p930_p4  ;;  %p768_p3 = pnand %p489_p2, %p727_p5 }
  0x17   : > { %s448_s30 = sshll.u32 %s121_s28, 6  ;;  %p549_p8 = scmp.ne.s32.totalorder %s111_s26, %s548_s3 }
  0x18   : > { %p550_p9 = pneg %p761_p7  ;;  %p556_p12 = scmp.lt.s32.totalorder %s111_s26, %s111_s26 }
  0x19   : > { %p557_p11 = scmp.lt.s32.totalorder %s548_s3, %s548_s3 }
  0x1a   : > { %p551_p10 = pnand %p550_p9, %p549_p8 }
  0x1b   : > { %p558_p1 = por %p557_p11, %p556_p12 }
  0x1c   : > { %p552_p0 = pneg %p551_p10 }
  0x1e   : > { %p559_p4 = pnand %p558_p1, %p552_p0 }
  0x20   : > { %562 = shalt.err (!%p559_p4)
}
  0x21   : > { %s665_s4 = smov [#allocation6]   ;;  %s466_s5 = sshll.u32 %s663_s12, 10 }
  0x22   : > { %479 = dma.vmem_to_smem (!%p761_p7), %s111_s26, 16, %s665_s4, [#allocation5]  }
  0x23   : > { %s125_s6 = scalar_lea.vmem [#allocation2], %s448_s30  ;;  %s780_s16 = scalar_lea.hbm %s926_s0, %s466_s5 }
  0x24   : > { %s132_s7 = sshll.u32 %s125_s6, 4  ;;  %s784_s17 = scalar_lea.sflag [#allocation3], %s121_s28  ;;  %s782_s7 = int_to_ptr.vmem [resolvable:$true] %s132_s7 }
  0x25   : > { %s563_s19 = scalar_lea.hbm %s780_s16, 1024  ;;  %p565_p5 = pneg %p768_p3 }
  0x26   : > { %p564_p4 = scmp.ne.s32.totalorder %s780_s16, %s563_s19  ;;  %s568_s26 = scalar_lea.hbm %s926_s0, 2048 }
  0x27   : > { %p569_p0 = scmp.lt.u32.totalorder %s780_s16, %s926_s0  ;;  %p570_p2 = scmp.lt.u32.totalorder %s568_s26, %s563_s19 }
  0x28   : > { %p566_p11 = pnand %p565_p5, %p564_p4  ;;  %p572_p8 = scmp.lt.u32.totalorder %s563_s19, %s780_s16 }
  0x29   : > { %p571_p7 = por %p570_p2, %p569_p0 }
  0x2a   : > { %p567_p12 = pneg %p566_p11 }
  0x2b   : > { %p573_p9 = por %p572_p8, %p571_p7 }
  0x2d   : > { %p574_p10 = pnand %p573_p9, %p567_p12 }
  0x2f   : > { %577 = shalt.err (!%p574_p10)
}
  0x30   : > { %s578_s28 = scalar_lea.vmem %s782_s7, 1024  ;;  %s666_s3 = smov [#allocation2]  }
  0x31   : > { %p579_p1 = scmp.ne.s32.totalorder %s782_s7, %s578_s28  ;;  %s583_s4 = sshll.u32 %s666_s3, 4  ;;  %s584_s4 = int_to_ptr.vmem [resolvable:$false] %s583_s4 }
  0x32   : > { %s585_s5 = scalar_lea.vmem %s584_s4, 2048  ;;  %p586_p6 = scmp.lt.s32.totalorder %s782_s7, %s584_s4 }
  0x33   : > { %p581_p4 = pnand %p579_p1, %p565_p5  ;;  %p587_p0 = scmp.lt.s32.totalorder %s585_s5, %s578_s28 }
  0x35   : > { %p582_p11 = pneg %p581_p4  ;;  %p588_p2 = por %p587_p0, %p586_p6 }
  0x37   : > { %p589_p7 = pnand %p588_p2, %p582_p11 }
  0x39   : > { %592 = shalt.err (!%p589_p7)
}
  0x3a   : > { %s667_s6 = smov 256   ;;  %s668_s8 = smov 16  }
  0x3b   : > { %483 = dma.hbm_to_vmem [thread:$0]  (!%p768_p3), %s780_s16, 1024, %s782_s7, %s784_s17, %s667_s6, %s667_s6, %s668_s8  }
  0x3c   : > { %144 = sbr.rel (%p748_p13) target bundleno = 418 (0x1a2), region = 28  ;;  %s815_s14 = sand.u32 (!%p748_p13), 1, %s655_s10  }
  0x3d   : > { %s452_s19 = sshll.u32 (!%p748_p13), %s815_s14, 6  ;;  %s147_s24 = scalar_lea.sflag (!%p748_p13), [#allocation3], %s815_s14 }
  0x3e   : > { %s150_s25 = scalar_lea.vmem (!%p748_p13), [#allocation2], %s452_s19  ;;  %p939_p6 = scmp.ne.s32.totalorder (!%p748_p13), %s933_s20, 0 }
  0x43   : > { %638 = dma.done.wait (%p939_p6), %s147_s24, 1024  }
  0x44   : > { %640 = vsyncadd (%p939_p6), %s147_s24, 4294966272  ;;  %p940_p3 = scmp.eq.s32.totalorder %s709_s13, 0 }
  0x46   : > { %642 = dma.done.wait (%p940_p3), [#allocation5], 16   ;;  %p941_p13 = pmov %p940_p3 }
  0x48   : > { %644 = vsyncadd (%p941_p13), [#allocation5], 4294967280 }
  0x49   : > { %159 = sfence }
  0x4a   : > { %v829_v0 = vld [vmem:[%s150_s25 + $0x20] sm:$0xff]  ;;  %v831_v1 = vld [vmem:[%s150_s25 + $0x28] sm:$0xff]  ;;  %v839_v5 = vld [vmem:[%s150_s25 + $0x30] sm:$0xff]  ;;  %v669_v12 = vmov 0   ;;  %s455_s20 = sld [smem:[#allocation6 + $0x1]]  ;;  %s456_s23 = sld [smem:[#allocation6 + $0x2]] }
  0x4b   : > { %v833_v2 = vld [vmem:[%s150_s25] sm:$0xff]  ;;  %v190_v3 = vadd.f32 %v831_v1, %v829_v0  ;;  %v837_v4 = vld [vmem:[%s150_s25 + $0x8] sm:$0xff]  ;;  %v841_v6 = vld [vmem:[%s150_s25 + $0x38] sm:$0xff]  ;;  %531 = vset.pattern.permute.xlu1 %v669_v12  ;;  %530 = vset.pattern.permute.xlu0 %v669_v12  ;;  %s219_s29 = sld [smem:[#allocation6]]  ;;  %vm204_vm0 = vcmask 1040384   ;;  %vm237_vm1 = vcmask 1046528  }
  0x4c   : > { %v184_v7 = vadd.f32 %v837_v4, %v833_v2  ;;  %v845_v8 = vld [vmem:[%s150_s25 + $0x10] sm:$0xff]  ;;  %v847_v9 = vld [vmem:[%s150_s25 + $0x18] sm:$0xff]  ;;  %v193_v10 = vadd.f32 %v841_v6, %v839_v5  ;;  %vm267_vm2 = vcmask 1045504   ;;  %s175_s7 = scalar_lea.vmem [#allocation7], %s452_s19  ;;  %s467_s16 = sshll.u32 %s709_s13, 10 }
  0x4d   : > { %191 = vadd.xlane.f32.xlu1 %v190_v3  ;;  %v187_v11 = vadd.f32 %v847_v9, %v845_v8  ;;  %s359_s17 = sshll.u32 %s175_s7, 4  ;;  %s878_s30 = scalar_lea.hbm %s928_s2, %s467_s16  ;;  %s880_s17 = int_to_ptr.vmem [resolvable:$true] %s359_s17 }
  0x4e   : > { %185 = vadd.xlane.f32.xlu0 %v184_v7  ;;  %s346_s13 = scalar_lea.sflag [#allocation4], %s815_s14  ;;  %s593_s28 = scalar_lea.vmem %s880_s17, 1024 }
  0x4f   : > { %p594_p5 = scmp.ne.s32.totalorder %s880_s17, %s593_s28  ;;  %p942_p12 = scmp.ne.s32.totalorder %s934_s21, 0 }
  0x50   : > { %v226_v22 = vstv %s455_s20  ;;  %v256_v23 = vstv %s456_s23  ;;  %s670_s3 = smov [#allocation7]  }
  0x51   : > { %194 = vadd.xlane.f32.xlu1 %v193_v10  ;;  %v220_v27 = vstv %s219_s29  ;;  %p595_p8 = pnand %p594_p5, %p942_p12  ;;  %s597_s4 = sshll.u32 %s670_s3, 4  ;;  %s598_s4 = int_to_ptr.vmem [resolvable:$false] %s597_s4 }
  0x52   : > { %188 = vadd.xlane.f32.xlu0 %v187_v11  ;;  %s599_s5 = scalar_lea.vmem %s598_s4, 2048  ;;  %p600_p10 = scmp.lt.s32.totalorder %s880_s17, %s598_s4 }
  0x53   : > { %p596_p9 = pneg %p595_p8  ;;  %p601_p1 = scmp.lt.s32.totalorder %s599_s5, %s593_s28 }
  0x55   : > { %p602_p4 = por %p601_p1, %p600_p10 }
  0x57   : > { %p603_p11 = pnand %p602_p4, %p596_p9 }
  0xda   : > { %v192_v13 = vpop.xlane.xlu1 %191 }
  0xdb   : > { %v198_v14 = vmul.f32 0.00390625, %v192_v13  ;;  %v186_v15 = vpop.xlane.xlu0 %185 }
  0xdc   : > { %v196_v16 = vmul.f32 0.00390625, %v186_v15 }
  0xdd   : > { %v208_v19 = vrot.slane %v198_v14, 7 }
  0xde   : > { %v205_v17 = vrot.slane %v196_v16, 7  ;;  %v195_v18 = vpop.xlane.xlu1 %194 }
  0xdf   : > { %v199_v20 = vmul.f32 0.00390625, %v195_v18  ;;  %v189_v21 = vpop.xlane.xlu0 %188 }
  0xe0   : > { %v217_v24 = vsel %vm204_vm0, 0.0, %v205_v17  ;;  %v197_v25 = vmul.f32 0.00390625, %v189_v21 }
  0xe1   : > { %v210_v26 = vrot.slane %v199_v20, 7  ;;  %v227_v29 = vmul.f32 %v226_v22, %v217_v24  ;;  %v257_v30 = vmul.f32 %v256_v23, %v217_v24  ;;  %v221_v38 = vmul.f32 %v220_v27, %v217_v24 }
  0xe2   : > { %v206_v28 = vrot.slane %v197_v25, 7 }
  0xe3   : > { %v211_v31 = vsel %vm204_vm0, %v208_v19, %v210_v26  ;;  %v218_v32 = vsel %vm204_vm0, %v210_v26, 0.0  ;;  %v238_v42 = vrot.slane %v227_v29, 1  ;;  %v268_v43 = vrot.slane %v257_v30, 2 }
  0xe4   : > { %v230_v33 = vmul.f32 %v226_v22, %v211_v31  ;;  %v231_v34 = vmul.f32 %v226_v22, %v218_v32  ;;  %v260_v35 = vmul.f32 %v256_v23, %v211_v31  ;;  %v207_v36 = vsel %vm204_vm0, %v205_v17, %v206_v28 }
  0xe5   : > { %v209_v37 = vsel %vm204_vm0, %v206_v28, %v208_v19  ;;  %v261_v41 = vmul.f32 %v256_v23, %v218_v32  ;;  %v228_v44 = vmul.f32 %v226_v22, %v207_v36  ;;  %v224_v46 = vmul.f32 %v220_v27, %v211_v31 }
  0xe6   : > { %v243_v39 = vrot.slane %v230_v33, 1  ;;  %v245_v40 = vrot.slane %v231_v34, 1  ;;  %v229_v45 = vmul.f32 %v226_v22, %v209_v37  ;;  %v258_v48 = vmul.f32 %v256_v23, %v207_v36 }
  0xe7   : > { %v259_v49 = vmul.f32 %v256_v23, %v209_v37  ;;  %v273_v50 = vrot.slane %v260_v35, 2  ;;  %v222_v51 = vmul.f32 %v220_v27, %v207_v36  ;;  %v239_v52 = vrot.slane %v228_v44, 1 }
  0xe8   : > { %v246_v47 = vsel %vm237_vm1, %v243_v39, %v245_v40  ;;  %v241_v53 = vrot.slane %v229_v45, 1  ;;  %v275_v54 = vrot.slane %v261_v41, 2  ;;  %v223_v55 = vmul.f32 %v220_v27, %v209_v37 }
  0xe9   : > { %v269_v56 = vrot.slane %v258_v48, 2  ;;  %v271_v57 = vrot.slane %v259_v49, 2  ;;  %v254_v58 = vadd.f32 %v246_v47, %v224_v46  ;;  %v240_v59 = vsel %vm237_vm1, %v238_v42, %v239_v52 }
  0xea   : > { %v242_v60 = vsel %vm237_vm1, %v239_v52, %v241_v53  ;;  %v244_v61 = vsel %vm237_vm1, %v241_v53, %v243_v39  ;;  %v251_v62 = vadd.f32 %v240_v59, %v221_v38  ;;  %v276_v12 = vsel %vm267_vm2, %v273_v50, %v275_v54 }
  0xeb   : > { %v252_v63 = vadd.f32 %v242_v60, %v222_v51  ;;  %v253_v3 = vadd.f32 %v244_v61, %v223_v55  ;;  %v270_v7 = vsel %vm267_vm2, %v268_v43, %v269_v56  ;;  %v272_v10 = vsel %vm267_vm2, %v269_v56, %v271_v57 }
  0xec   : > { %v274_v11 = vsel %vm267_vm2, %v271_v57, %v273_v50  ;;  %v281_v13 = vadd.f32 %v270_v7, %v251_v62  ;;  %v284_v16 = vadd.f32 %v276_v12, %v254_v58 }
  0xed   : > { %v282_v14 = vadd.f32 %v272_v10, %v252_v63  ;;  %v283_v15 = vadd.f32 %v274_v11, %v253_v3 }
  0xee   : > { %v457_v17 = vmul.f32 -1.442695, %v281_v13  ;;  %v460_v20 = vmul.f32 -1.442695, %v284_v16 }
  0xef   : > { %v458_v18 = vmul.f32 -1.442695, %v282_v14  ;;  %v459_v19 = vmul.f32 -1.442695, %v283_v15 }
  0xf0   : > { %532 = vpow2.f32 %v457_v17 }
  0xf1   : > { %534 = vpow2.f32 %v458_v18 }
  0xf2   : > { %536 = vpow2.f32 %v459_v19 }
  0xf3   : > { %538 = vpow2.f32 %v460_v20 }
  0xfa   : > { %v533_v21 = vpop.eup %532 }
  0xfb   : > { %v535_v22 = vpop.eup %534  ;;  %v297_v23 = vadd.f32 1.0, %v533_v21 }
  0xfc   : > { %v537_v24 = vpop.eup %536  ;;  %v298_v25 = vadd.f32 1.0, %v535_v22 }
  0xfd   : > { %540 = vrcp.f32 %v297_v23  ;;  %v299_v26 = vadd.f32 1.0, %v537_v24  ;;  %v539_v27 = vpop.eup %538 }
  0xfe   : > { %542 = vrcp.f32 %v298_v25  ;;  %v300_v28 = vadd.f32 1.0, %v539_v27 }
  0xff   : > { %544 = vrcp.f32 %v299_v26 }
 0x100   : > { %546 = vrcp.f32 %v300_v28 }
 0x107   : > { %v541_v29 = vpop.eup %540 }
 0x108   : > { %v543_v30 = vpop.eup %542  ;;  %311 = vperm.xlu0 %530, %v541_v29  }
 0x109   : > { %316 = vperm.xlu1 %531, %v543_v30   ;;  %v545_v31 = vpop.eup %544 }
 0x10a   : > { %v547_v32 = vpop.eup %546 }
 0x10d   : > { %321 = vperm.xlu1 %531, %v545_v31  }
 0x111   : > { %326 = vperm.xlu1 %531, %v547_v32  }
 0x187   : > { %v312_v33 = vpop.permute.xlu0 %311 }
 0x188   : > { %v329_v34 = vmul.f32 %v312_v33, %v833_v2  ;;  %v330_v35 = vmul.f32 %v312_v33, %v837_v4  ;;  %v317_v36 = vpop.permute.xlu1 %316 }
 0x189   : > { %v331_v37 = vmul.f32 %v317_v36, %v845_v8  ;;  %v332_v38 = vmul.f32 %v317_v36, %v847_v9 }
 0x18a   : > { %337 = vst [vmem:[%s175_s7] sm:$0xff] %v329_v34  ;;  %338 = vst [vmem:[%s175_s7 + $0x8] sm:$0xff] %v330_v35 }
 0x18b   : > { %339 = vst [vmem:[%s175_s7 + $0x10] sm:$0xff] %v331_v37  ;;  %340 = vst [vmem:[%s175_s7 + $0x18] sm:$0xff] %v332_v38 }
 0x18c   : > { %v322_v39 = vpop.permute.xlu1 %321 }
 0x18d   : > { %v333_v40 = vmul.f32 %v322_v39, %v829_v0  ;;  %v334_v2 = vmul.f32 %v322_v39, %v831_v1 }
 0x18f   : > { %341 = vst [vmem:[%s175_s7 + $0x20] sm:$0xff] %v333_v40  ;;  %342 = vst [vmem:[%s175_s7 + $0x28] sm:$0xff] %v334_v2 }
 0x190   : > { %v327_v4 = vpop.permute.xlu1 %326 }
 0x191   : > { %v335_v0 = vmul.f32 %v327_v4, %v839_v5  ;;  %v336_v8 = vmul.f32 %v327_v4, %v841_v6 }
 0x193   : > { %343 = vst [vmem:[%s175_s7 + $0x30] sm:$0xff] %v335_v0  ;;  %344 = vst [vmem:[%s175_s7 + $0x38] sm:$0xff] %v336_v8 }
 0x194   : > { %606 = shalt.err (!%p603_p11)
}
 0x195   : > { %s607_s6 = scalar_lea.hbm %s878_s30, 1024  ;;  %s611_s24 = scalar_lea.hbm %s928_s2, 2048 }
 0x196   : > { %p608_p0 = scmp.ne.s32.totalorder %s878_s30, %s607_s6  ;;  %p612_p6 = scmp.lt.u32.totalorder %s878_s30, %s928_s2 }
 0x197   : > { %p613_p3 = scmp.lt.u32.totalorder %s611_s24, %s607_s6  ;;  %p615_p5 = scmp.lt.u32.totalorder %s607_s6, %s878_s30 }
 0x198   : > { %p609_p2 = pnand %p608_p0, %p942_p12 }
 0x199   : > { %p614_p13 = por %p613_p3, %p612_p6 }
 0x19a   : > { %p610_p7 = pneg %p609_p2 }
 0x19b   : > { %p616_p8 = por %p615_p5, %p614_p13 }
 0x19d   : > { %p617_p9 = pnand %p616_p8, %p610_p7 }
 0x19f   : > { %620 = shalt.err (!%p617_p9)
}
 0x1a0   : > { %s671_s23 = smov 256   ;;  %s672_s29 = smov 16  }
 0x1a1   : > { %474 = dma.vmem_to_hbm [thread:$0]  (%p942_p12), %s880_s17, 1024, %s878_s30, %s346_s13, %s671_s23, %s671_s23, %s672_s29  }
 0x1a2 PF: > { %s374_s7 = sand.u32 1, %s651_s9   ;;  %p943_p10 = scmp.ne.s32.totalorder %s935_s22, 0 }
 0x1a3   : > { %p944_p1 = scmp.ge.s32.totalorder %s663_s12, 2  ;;  %s375_s16 = scalar_lea.sflag [#allocation4], %s374_s7 }
 0x1a5   : > { %p485_p4 = pnand %p944_p1, %p943_p10 }
 0x1a7   : > { %646 = dma.done.wait (!%p485_p4), %s375_s16, 1024  }
 0x1a8   : > { %648 = vsyncadd (!%p485_p4), %s375_s16, 4294966272  ;;  %p16_p11 = scmp.ge.s32.totalorder %s713_s15, 4   ;;  %s945_s9 = smov %s655_s10 }
 0x1a9   : > { %s946_s10 = smov %s659_s11  ;;  %s947_s11 = smov %s725_s18 }
 0x1aa   : > { %s948_s12 = smov %s713_s15  ;;  %18 = sbr.rel (!%p16_p11) target bundleno = 6 (0x6), region = 78 }
 0x1b1   :  { %380 = vsyncpa [#allocation3], 1 }
 0x1b2   :  { %382 = vsyncpa [#allocation3 + $0x1], 1 }
 0x1b3   :  { %383 = vsyncpa [#allocation4], 1 }
 0x1b4   :  { %385 = vsyncpa [#allocation4 + $0x1], 1 }
 0x1b5   :  { %386 = vsyncpa [#allocation5], 1 }
 0x1b6   :  { %388 = vsyncpa [#allocation5 + $0x1], 1 }

</bundles_post_ra>
